<compile_context>
chip_gen: v5e
topology: v5e:2x2
jax: 0.10.0
libtpu: 0.0.40
codegen_flags: <defaults>
</compile_context>

<pallas_src>
import functools

import jax
import jax.numpy as jnp
from jax.experimental import pallas as pl
from jax.experimental.pallas import tpu as pltpu

LN_EPS = 1e-5


def _round_up(x, m):
    return ((x + m - 1) // m) * m


def _prenorm_linear_kernel(x_ref, g_ref, b_ref, w_ref, wb_ref, o_ref):
    # x_ref: (TR, D) tile of tokens; g/b: (1, D) LayerNorm affine params;
    # w_ref: (D, TN) bf16 slice of the fn (Linear) weight; wb_ref: (1, TN) bias.
    x = x_ref[...].astype(jnp.float32)

    # LayerNorm over the last (lane) dimension, biased variance, eps=1e-5.
    # Stats kept in f32 regardless of input dtype.
    mean = jnp.mean(x, axis=-1, keepdims=True)
    centered = x - mean
    var = jnp.mean(centered * centered, axis=-1, keepdims=True)
    xn = centered * jax.lax.rsqrt(var + LN_EPS)
    y = xn * g_ref[...].astype(jnp.float32) + b_ref[...].astype(jnp.float32)

    # fn = Linear: bf16 operands on the MXU, f32 accumulation.
    out = jnp.dot(y.astype(jnp.bfloat16), w_ref[...],
                  preferred_element_type=jnp.float32)
    out = out + wb_ref[...].astype(jnp.float32)
    o_ref[...] = out.astype(o_ref.dtype)


@functools.partial(jax.jit, static_argnames=("tile_rows", "tile_n"))
def prenorm_linear(x, gamma, beta, w, wb, *, tile_rows=256, tile_n=256):
    """x: (B, N, D); gamma/beta: (D,); w: (D, D_out); wb: (D_out,)."""
    B, N, D = x.shape
    D_out = w.shape[1]
    R = B * N

    # --- row tiling: large tiles, padded (no divisibility requirement) ------
    sublane = 16 if x.dtype == jnp.bfloat16 else 8
    tr = min(tile_rows, _round_up(R, sublane))
    tr = _round_up(tr, sublane)
    R_pad = _round_up(R, tr)

    # --- output-column tiling: lane-dense (multiple of 128) -----------------
    do_128 = _round_up(D_out, 128)
    tn = min(tile_n, do_128)
    tn = _round_up(tn, 128)
    Do_pad = _round_up(do_128, tn)

    x2 = x.reshape(R, D)
    if R_pad != R:
        x2 = jnp.pad(x2, ((0, R_pad - R), (0, 0)))

    g2 = gamma.reshape(1, D)
    b2 = beta.reshape(1, D)

    # Cast weight to bf16 once (halves weight DMA bytes, native MXU rate);
    # pad the output dimension so stores are unmasked full-lane vst.
    w_b16 = w.astype(jnp.bfloat16)
    wb2 = wb.reshape(1, D_out)
    if Do_pad != D_out:
        w_b16 = jnp.pad(w_b16, ((0, 0), (0, Do_pad - D_out)))
        wb2 = jnp.pad(wb2, ((0, 0), (0, Do_pad - D_out)))

    grid = (R_pad // tr, Do_pad // tn)

    out2 = pl.pallas_call(
        _prenorm_linear_kernel,
        out_shape=jax.ShapeDtypeStruct((R_pad, Do_pad), x.dtype),
        grid_spec=pltpu.PrefetchScalarGridSpec(
            num_scalar_prefetch=0,
            grid=grid,
            in_specs=[
                pl.BlockSpec((tr, D), lambda i, j: (i, 0)),    # x row tile
                pl.BlockSpec((1, D), lambda i, j: (0, 0)),     # gamma
                pl.BlockSpec((1, D), lambda i, j: (0, 0)),     # beta
                pl.BlockSpec((D, tn), lambda i, j: (0, j)),    # fn weight slice
                pl.BlockSpec((1, tn), lambda i, j: (0, j)),    # fn bias slice
            ],
            out_specs=pl.BlockSpec((tr, tn), lambda i, j: (i, j)),
        ),
        compiler_params=pltpu.CompilerParams(
            dimension_semantics=("parallel", "parallel"),
            vmem_limit_bytes=48 * 1024 * 1024,
        ),
    )(x2, g2, b2, w_b16, wb2)

    return out2[:R, :D_out].reshape(B, N, D_out)


def _reference(x, gamma, beta, w, wb):
    xf = x.astype(jnp.float32)
    mean = jnp.mean(xf, axis=-1, keepdims=True)
    var = jnp.mean((xf - mean) ** 2, axis=-1, keepdims=True)
    xn = (xf - mean) / jnp.sqrt(var + LN_EPS)
    y = xn * gamma + beta
    return (y @ w + wb).astype(x.dtype)


if __name__ == "__main__":
    key = jax.random.PRNGKey(0)
    B, N, D = 2, 8, 32  # batch=2, seq=8, hidden dim=32

    kx, kg, kb, kw, kwb = jax.random.split(key, 5)
    x = jax.random.normal(kx, (B, N, D), dtype=jnp.float32)

    # Deterministic parameter init (LayerNorm: gamma=1, beta=0 as in
    # nn.LayerNorm; fn = Linear(D, D) with small random weights).
    gamma = jnp.ones((D,), dtype=jnp.float32)
    beta = jnp.zeros((D,), dtype=jnp.float32)
    w = jax.random.normal(kw, (D, D), dtype=jnp.float32) * (1.0 / jnp.sqrt(D))
    wb = jax.random.normal(kwb, (D,), dtype=jnp.float32) * 0.01

    out = prenorm_linear(x, gamma, beta, w, wb)
    out = jax.block_until_ready(out)

    ref = _reference(x, gamma, beta, w, wb)
    assert out.shape == (B, N, D)
    # bf16 MXU operands (f32 accumulation) -> slightly looser tolerance than
    # a pure-f32 matmul.
    assert jnp.allclose(out, ref, atol=2e-2, rtol=2e-2), "mismatch vs reference"

    print("KERNEL_OK")
</pallas_src>

<mosaic_0001>
module attributes {stable_mosaic.version = 11 : i64} {
  func.func @_prenorm_linear_kernel(%arg0: i32, %arg1: i32, %arg2: memref<16x32xf32, #tpu.memory_space<vmem>>, %arg3: memref<1x32xf32, #tpu.memory_space<vmem>>, %arg4: memref<1x32xf32, #tpu.memory_space<vmem>>, %arg5: memref<32x128xbf16, #tpu.memory_space<vmem>>, %arg6: memref<1x128xf32, #tpu.memory_space<vmem>>, %arg7: memref<16x128xf32, #tpu.memory_space<vmem>>) attributes {dimension_semantics = [#tpu.dimension_semantics<parallel>, #tpu.dimension_semantics<parallel>], iteration_bounds = array<i64: 1, 1>, scalar_prefetch = 0 : i64, scratch_operands = 0 : i64, tpu.core_type = #tpu.core_type<tc>, window_params = [{transform_indices = @transform_0, window_bounds = array<i64: 16, 32>}, {pipeline_mode = #tpu.pipeline_mode<synchronous>, transform_indices = @transform_1, window_bounds = array<i64: 1, 32>}, {pipeline_mode = #tpu.pipeline_mode<synchronous>, transform_indices = @transform_2, window_bounds = array<i64: 1, 32>}, {transform_indices = @transform_3, window_bounds = array<i64: 32, 128>}, {transform_indices = @transform_4, window_bounds = array<i64: 1, 128>}, {transform_indices = @transform_5, window_bounds = array<i64: 16, 128>}]} {
    %c0 = arith.constant 0 : index
    %c0_0 = arith.constant 0 : index
    %0 = vector.load %arg2[%c0, %c0_0] : memref<16x32xf32, #tpu.memory_space<vmem>>, vector<16x32xf32>
    %cst = arith.constant dense<0.000000e+00> : vector<16xf32>
    %1 = vector.multi_reduction <add>, %0, %cst [1] : vector<16x32xf32> to vector<16xf32>
    %2 = vector.shape_cast %1 : vector<16xf32> to vector<16x1xf32>
    %cst_1 = arith.constant 3.200000e+01 : f32
    %3 = vector.broadcast %cst_1 : f32 to vector<16x1xf32>
    %4 = arith.divf %2, %3 : vector<16x1xf32>
    %5 = vector.broadcast %4 : vector<16x1xf32> to vector<16x32xf32>
    %6 = arith.subf %0, %5 : vector<16x32xf32>
    %7 = arith.mulf %6, %6 : vector<16x32xf32>
    %cst_2 = arith.constant dense<0.000000e+00> : vector<16xf32>
    %8 = vector.multi_reduction <add>, %7, %cst_2 [1] : vector<16x32xf32> to vector<16xf32>
    %9 = vector.shape_cast %8 : vector<16xf32> to vector<16x1xf32>
    %cst_3 = arith.constant 3.200000e+01 : f32
    %10 = vector.broadcast %cst_3 : f32 to vector<16x1xf32>
    %11 = arith.divf %9, %10 : vector<16x1xf32>
    %cst_4 = arith.constant 9.99999974E-6 : f32
    %12 = vector.broadcast %cst_4 : f32 to vector<16x1xf32>
    %13 = arith.addf %11, %12 : vector<16x1xf32>
    %14 = math.rsqrt %13 : vector<16x1xf32>
    %15 = vector.broadcast %14 : vector<16x1xf32> to vector<16x32xf32>
    %16 = arith.mulf %6, %15 : vector<16x32xf32>
    %c0_5 = arith.constant 0 : index
    %c0_6 = arith.constant 0 : index
    %17 = vector.load %arg3[%c0_5, %c0_6] : memref<1x32xf32, #tpu.memory_space<vmem>>, vector<1x32xf32>
    %18 = vector.broadcast %17 : vector<1x32xf32> to vector<16x32xf32>
    %19 = arith.mulf %16, %18 : vector<16x32xf32>
    %c0_7 = arith.constant 0 : index
    %c0_8 = arith.constant 0 : index
    %20 = vector.load %arg4[%c0_7, %c0_8] : memref<1x32xf32, #tpu.memory_space<vmem>>, vector<1x32xf32>
    %21 = vector.broadcast %20 : vector<1x32xf32> to vector<16x32xf32>
    %22 = arith.addf %19, %21 : vector<16x32xf32>
    %23 = arith.truncf %22 : vector<16x32xf32> to vector<16x32xbf16>
    %c0_9 = arith.constant 0 : index
    %c0_10 = arith.constant 0 : index
    %24 = vector.load %arg5[%c0_9, %c0_10] : memref<32x128xbf16, #tpu.memory_space<vmem>>, vector<32x128xbf16>
    %cst_11 = arith.constant dense<0.000000e+00> : vector<16x128xf32>
    %25 = tpu.matmul %23, %24, %cst_11 {dimension_numbers = #tpu.dot_dimension_numbers<[1], [0], [0], [1], [0, 0, 1, 1], [], []>} : vector<16x32xbf16>, vector<32x128xbf16>, vector<16x128xf32> -> vector<16x128xf32>
    %c0_12 = arith.constant 0 : index
    %c0_13 = arith.constant 0 : index
    %26 = vector.load %arg6[%c0_12, %c0_13] : memref<1x128xf32, #tpu.memory_space<vmem>>, vector<1x128xf32>
    %27 = vector.broadcast %26 : vector<1x128xf32> to vector<16x128xf32>
    %28 = arith.addf %25, %27 : vector<16x128xf32>
    %c0_14 = arith.constant 0 : index
    %c0_15 = arith.constant 0 : index
    %29 = vector.load %arg7[%c0_14, %c0_15] : memref<16x128xf32, #tpu.memory_space<vmem>>, vector<16x128xf32>
    tpu.vector_store %arg7[%c0_14, %c0_15], %28 {strides = array<i32>} : memref<16x128xf32, #tpu.memory_space<vmem>>, vector<16x128xf32>,
    return
  }
  func.func @transform_0(%arg0: i32, %arg1: i32) -> (i32, i32) {
    %c0_i32 = arith.constant 0 : i32
    %c0_i32_0 = arith.constant 0 : i32
    return %arg0, %c0_i32 : i32, i32
  }
  func.func @transform_1(%arg0: i32, %arg1: i32) -> (i32, i32) {
    %c0_i32 = arith.constant 0 : i32
    %c0_i32_0 = arith.constant 0 : i32
    %c0_i32_1 = arith.constant 0 : i32
    return %c0_i32, %c0_i32_0 : i32, i32
  }
  func.func @transform_2(%arg0: i32, %arg1: i32) -> (i32, i32) {
    %c0_i32 = arith.constant 0 : i32
    %c0_i32_0 = arith.constant 0 : i32
    %c0_i32_1 = arith.constant 0 : i32
    return %c0_i32, %c0_i32_0 : i32, i32
  }
  func.func @transform_3(%arg0: i32, %arg1: i32) -> (i32, i32) {
    %c0_i32 = arith.constant 0 : i32
    %c0_i32_0 = arith.constant 0 : i32
    return %c0_i32, %arg1 : i32, i32
  }
  func.func @transform_4(%arg0: i32, %arg1: i32) -> (i32, i32) {
    %c0_i32 = arith.constant 0 : i32
    %c0_i32_0 = arith.constant 0 : i32
    return %c0_i32, %arg1 : i32, i32
  }
  func.func @transform_5(%arg0: i32, %arg1: i32) -> (i32, i32) {
    %c0_i32 = arith.constant 0 : i32
    return %arg0, %arg1 : i32, i32
  }
}

</mosaic_0001>

<bundles_post_ra>
// kernel: prenorm_linear.1
= control target key start
LH: loop header
LB: loop body
LE: loop exit
PB: predicated region body
PF: predicated region fallthrough
CT: control target
= control target key end

     0   :  { %vm23_vm0 = vcmask 261120   ;;  %v152_v4 = vmov 32.0   ;;  %s215_s0 = inlined_call_operand.vmem [shape: f32[16,32], index: 0, kind: input, shape index: {}]   ;;  %s216_s1 = inlined_call_operand.vmem [shape: f32[1,32], index: 1, kind: input, shape index: {}]   ;;  %s217_s2 = inlined_call_operand.vmem [shape: f32[1,32], index: 2, kind: input, shape index: {}]   ;;  %s218_s4 = inlined_call_operand.vmem [shape: f32[1,128], index: 4, kind: input, shape index: {}]   ;;  %s219_s3 = inlined_call_operand.vmem [shape: bf16[32,128], index: 3, kind: input, shape index: {}]   ;;  %s220_s5 = inlined_call_operand.vmem [shape: f32[16,128], index: 5, kind: output, shape index: {}]  }
   0x1   :  { %v21_v0 = vld [vmem:[%s215_s0] sm:$0xff]  ;;  %v22_v2 = vld [vmem:[%s215_s0 + $0x8] sm:$0xff]  ;;  %146 = vrcp.f32 %v152_v4 }
   0x2   :  { %v24_v1 = vsel %vm23_vm0, %v21_v0, 0.0  ;;  %v27_v3 = vsel %vm23_vm0, %v22_v2, 0.0  ;;  %v141_v21 = vld [vmem:[%s219_s3 + $0x8] sm:$0xff]  ;;  %v140_v23 = vld [vmem:[%s219_s3] sm:$0xff] }
   0x3   :  { %25 = vadd.xlane.f32.xlu0 %v24_v1  ;;  %117 = vmatpush.bf16.msra.mxu0 %v141_v21  ;;  %v143_v42 = vld [vmem:[%s216_s1] ss:$0 sm:$0xff] }
   0x4   :  { %v144_v47 = vld [vmem:[%s217_s2] ss:$0 sm:$0xff] }
   0x5   :  { %v145_v52 = vld [vmem:[%s218_s4] ss:$0 sm:$0xff] }
   0x7   :  { %v147_v5 = vpop.eup %146  ;;  %118 = vmatpush.bf16.msra.mxu0 %v140_v23 }
   0x8   :  { %v31_v6 = vmul.f32 32.0, %v147_v5  ;;  %vm35_vm1 = vweird.f32 %v147_v5 }
   0xa   :  { %v32_v7 = vsub.f32 1.0, %v31_v6 }
   0xb   :  { %28 = vadd.xlane.f32.xlu0 %v27_v3 }
   0xc   :  { %v33_v8 = vmul.f32 %v147_v5, %v32_v7 }
   0xe   :  { %v34_v9 = vadd.f32 %v147_v5, %v33_v8 }
  0x10   :  { %v36_v10 = vsel %vm35_vm1, %v147_v5, %v34_v9 }
  0x76   :  { %v26_v11 = vpop.xlane.xlu0 %25 }
  0x77   :  { %v37_v12 = vmul.f32 %v36_v10, %v26_v11 }
  0x79   :  { %v39_v13 = vsub.f32 %v21_v0, %v37_v12 }
  0x7b   :  { %v41_v14 = vmul.f32 %v39_v13, %v39_v13 }
  0x7d   :  { %v43_v15 = vsel %vm23_vm0, %v41_v14, 0.0 }
  0x7e   :  { %44 = vadd.xlane.f32.xlu1 %v43_v15  ;;  %v29_v16 = vpop.xlane.xlu0 %28 }
  0x7f   :  { %v38_v17 = vmul.f32 %v36_v10, %v29_v16 }
  0x81   :  { %v40_v18 = vsub.f32 %v22_v2, %v38_v17 }
  0x83   :  { %v42_v19 = vmul.f32 %v40_v18, %v40_v18 }
  0x85   :  { %v46_v20 = vsel %vm23_vm0, %v42_v19, 0.0 }
  0x86   :  { %47 = vadd.xlane.f32.xlu1 %v46_v20 }
  0xf1   :  { %v45_v22 = vpop.xlane.xlu1 %44 }
  0xf2   :  { %v49_v24 = vmul.f32 %v45_v22, %v36_v10 }
  0xf4   :  { %v51_v25 = vadd.f32 1e-05, %v49_v24 }
  0xf6   :  { %148 = vrsqrt.f32 %v51_v25  ;;  %vm59_vm3 = vweird.f32 %v51_v25 }
  0xf9   :  { %v48_v26 = vpop.xlane.xlu1 %47 }
  0xfa   :  { %v50_v27 = vmul.f32 %v48_v26, %v36_v10 }
  0xfc   :  { %v149_v28 = vpop.eup %148  ;;  %v52_v29 = vadd.f32 1e-05, %v50_v27 }
  0xfd   :  { %v54_v30 = vmul.f32 %v149_v28, %v51_v25  ;;  %vm60_vm2 = vweird.f32 %v149_v28 }
  0xfe   :  { %150 = vrsqrt.f32 %v52_v29  ;;  %vm61_vm4 = vmor %vm59_vm3, %vm60_vm2  ;;  %vm69_vm6 = vweird.f32 %v52_v29 }
  0xff   :  { %v55_v31 = vmul.f32 %v149_v28, %v54_v30 }
 0x101   :  { %v56_v32 = vmul.f32 0.5, %v55_v31 }
 0x103   :  { %v57_v33 = vsub.f32 1.5, %v56_v32 }
 0x104   :  { %v151_v34 = vpop.eup %150 }
 0x105   :  { %v58_v35 = vmul.f32 %v149_v28, %v57_v33  ;;  %v64_v36 = vmul.f32 %v151_v34, %v52_v29  ;;  %vm70_vm5 = vweird.f32 %v151_v34 }
 0x106   :  { %vm71_vm7 = vmor %vm69_vm6, %vm70_vm5 }
 0x107   :  { %v65_v37 = vmul.f32 %v151_v34, %v64_v36  ;;  %v62_v38 = vsel %vm61_vm4, %v149_v28, %v58_v35 }
 0x108   :  { %v73_v41 = vmul.f32 %v62_v38, %v39_v13 }
 0x109   :  { %v66_v39 = vmul.f32 0.5, %v65_v37 }
 0x10a   :  { %v79_v46 = vmul.f32 %v143_v42, %v73_v41 }
 0x10b   :  { %v67_v40 = vsub.f32 1.5, %v66_v39 }
 0x10c   :  { %v85_v49 = vadd.f32 %v144_v47, %v79_v46 }
 0x10d   :  { %v68_v43 = vmul.f32 %v151_v34, %v67_v40 }
 0x10f   :  { %v72_v44 = vsel %vm71_vm7, %v151_v34, %v68_v43 }
 0x110   :  { %v74_v45 = vmul.f32 %v72_v44, %v40_v18 }
 0x112   :  { %v80_v48 = vmul.f32 %v143_v42, %v74_v45 }
 0x114   :  { %v86_v50 = vadd.f32 %v144_v47, %v80_v48 }
 0x116   :  { %v87_v51 = vpack.c.bf16 %v86_v50, %v85_v49 }
 0x118   :  { %139 = vmatmul.msk.bf16.vlgmr.msra.gmra.mxu0 %vm23_vm0, %v87_v51 }
 0x195   :  { %v120_v53 = vpop.f32.mrf.mxu0 }
 0x196   :  { %v121_v54 = vadd.f32 %v145_v52, %v120_v53 }
 0x198   :  { %125 = vst [vmem:[%s220_s5] sm:$0xff] %v121_v54 }
 0x19d   :  { %v122_v55 = vpop.f32.mrf.mxu0 }
 0x19e   :  { %v123_v56 = vadd.f32 %v145_v52, %v122_v55 }
 0x1a0   :  { %126 = vst [vmem:[%s220_s5 + $0x8] sm:$0xff] %v123_v56 }

</bundles_post_ra>
